<compile_context>
chip_gen: v7x
topology: tpu7x:2x2x1
jax: 0.10.0
libtpu: 0.0.40
codegen_flags: <defaults>
</compile_context>

<pallas_src>
import functools
import math

import jax
import jax.numpy as jnp
from jax.experimental import pallas as pl
from jax.experimental.pallas import tpu as pltpu


def _round_up(x: int, m: int) -> int:
    return (x + m - 1) // m * m


def _pad2(a, pad_r, pad_c):
    if pad_r or pad_c:
        return jnp.pad(a, ((0, pad_r), (0, pad_c)))
    return a


# ---------------------------------------------------------------------------
# Pallas kernel: one (bm, bn) output tile, K streamed on the innermost axis
# ---------------------------------------------------------------------------
def _linear_mod_kernel(*refs, has_bias):
    """refs (in order):
         style_ref : (1, bk)   f32   modulation slice along K
         inv_ref   : (1, bn)   f32   per-output-column rsqrt demod coefficient
         [b_ref]   : (1, bn)   f32   bias slice (only if has_bias)
         x_ref     : (bm, bk)  bf16  input tile
         w_ref     : (bk, bn)  bf16  weight tile, already transposed (K, O)
         o_ref     : (bm, bn)  out   output tile
         acc_ref   : (bm, bn)  f32   accumulator scratch
    """
    if has_bias:
        style_ref, inv_ref, b_ref, x_ref, w_ref, o_ref, acc_ref = refs
    else:
        style_ref, inv_ref, x_ref, w_ref, o_ref, acc_ref = refs
        b_ref = None

    k = pl.program_id(2)
    nk = pl.num_programs(2)

    @pl.when(k == 0)
    def _():
        acc_ref[...] = jnp.zeros_like(acc_ref)

    # Fold style into the activations (f32 multiply, bf16 MXU feed).
    x_mod = (x_ref[...].astype(jnp.float32) * style_ref[...]).astype(jnp.bfloat16)

    # Plain (bm, bk) x (bk, bn) MXU matmul with f32 accumulation — the weight
    # tile is used as-is (no modulation, no transpose).
    acc_ref[...] += jnp.dot(x_mod, w_ref[...], preferred_element_type=jnp.float32)

    # Epilogue on the last K step: demodulate + (optional) bias, f32.
    @pl.when(k == nk - 1)
    def _():
        out = acc_ref[...] * inv_ref[...]
        if has_bias:
            out = out + b_ref[...]
        o_ref[...] = out.astype(o_ref.dtype)


# ---------------------------------------------------------------------------
# Wrapper
# ---------------------------------------------------------------------------
def linear_mod(x, style, weight, bias=None, *, eps=1e-5, bm=256, bn=512, bk=1024):
    out_features, in_features = weight.shape

    # PyTorch semantics: a >1-D style collapses to its first row.
    if style.ndim > 1:
        style = style.reshape(-1, style.shape[-1])[0]

    lead = x.shape[:-1]
    M = int(math.prod(lead)) if lead else 1
    x2 = x.reshape(M, in_features)
    out_dtype = x.dtype

    s_f32 = style.astype(jnp.float32)
    w_f32 = weight.astype(jnp.float32)

    # Tiny (O,) demod coefficient: rsqrt(sum_k w^2 * s^2 + eps).  O(O*K) work,
    # negligible vs the M*O*K matmul; style-dependent so recomputed per call.
    inv_decoef = jax.lax.rsqrt(jnp.dot(w_f32 * w_f32, s_f32 * s_f32) + eps)  # (O,)

    # ---- padding / tile derivation -------------------------------------------
    K, O = in_features, out_features
    Kp = _round_up(K, 128)
    Op = _round_up(O, 128)
    bm_eff = min(bm, _round_up(M, 8))
    bn_eff = min(bn, Op)
    bk_eff = min(bk, Kp)
    Mp = _round_up(M, bm_eff)
    Op = _round_up(Op, bn_eff)
    Kp = _round_up(Kp, bk_eff)

    # bf16 streaming operands (x and transposed weight); f32 vectors.
    x_p = _pad2(x2.astype(jnp.bfloat16), Mp - M, Kp - K)                 # (Mp, Kp)
    w_p = _pad2(w_f32.T.astype(jnp.bfloat16), Kp - K, Op - O)            # (Kp, Op)
    s_p = _pad2(s_f32.reshape(1, K), 0, Kp - K)                          # (1, Kp)
    inv_p = _pad2(inv_decoef.reshape(1, O), 0, Op - O)                   # (1, Op)

    inputs = [s_p, inv_p]
    in_specs = [
        pl.BlockSpec((1, bk_eff), lambda i, j, k: (0, k)),   # style slice
        pl.BlockSpec((1, bn_eff), lambda i, j, k: (0, j)),   # inv_decoef slice
    ]
    has_bias = bias is not None
    if has_bias:
        b_p = _pad2(bias.astype(jnp.float32).reshape(1, O), 0, Op - O)   # (1, Op)
        inputs.append(b_p)
        in_specs.append(pl.BlockSpec((1, bn_eff), lambda i, j, k: (0, j)))
    inputs += [x_p, w_p]
    in_specs += [
        pl.BlockSpec((bm_eff, bk_eff), lambda i, j, k: (i, k)),   # x tile
        pl.BlockSpec((bk_eff, bn_eff), lambda i, j, k: (k, j)),   # weight tile (K, O)
    ]

    grid = (Mp // bm_eff, Op // bn_eff, Kp // bk_eff)

    cost = pl.CostEstimate(
        flops=2 * Mp * Op * Kp,
        transcendentals=0,
        bytes_accessed=(x_p.size * 2 + w_p.size * 2 + Mp * Op * 4
                        + s_p.size * 4 + inv_p.size * 4),
    )

    out = pl.pallas_call(
        functools.partial(_linear_mod_kernel, has_bias=has_bias),
        out_shape=jax.ShapeDtypeStruct((Mp, Op), out_dtype),
        grid=grid,
        in_specs=in_specs,
        out_specs=pl.BlockSpec((bm_eff, bn_eff), lambda i, j, k: (i, j)),
        scratch_shapes=[pltpu.VMEM((bm_eff, bn_eff), jnp.float32)],
        compiler_params=pltpu.CompilerParams(
            # K is a reduction axis (accumulator) -> "arbitrary"; M/N parallel.
            dimension_semantics=("parallel", "parallel", "arbitrary"),
            # Safe on v7x (64 MiB physical per TC); default tiles use ~5 MiB,
            # so larger bm/bn can be chosen per generation without OOM.
            vmem_limit_bytes=56 * 1024 * 1024,
        ),
        cost_estimate=cost,
    )(*inputs)

    return out[:M, :out_features].reshape(*lead, out_features)


# ---------------------------------------------------------------------------
if __name__ == "__main__":
    key = jax.random.PRNGKey(0)
    k_w, k_b, k_x, k_s = jax.random.split(key, 4)

    in_features, out_features = 32, 32
    batch, seq = 2, 8

    # kaiming_uniform_(a=sqrt(5)) on (out, in) -> U(-1/sqrt(fan_in), 1/sqrt(fan_in))
    lim = 1.0 / math.sqrt(in_features)
    weight = jax.random.uniform(k_w, (out_features, in_features), jnp.float32,
                                -lim, lim)
    bias = jax.random.uniform(k_b, (out_features,), jnp.float32, -lim, lim)

    x = jax.random.normal(k_x, (batch, seq, in_features), jnp.float32)
    style = jax.random.normal(k_s, (batch, in_features), jnp.float32) + 1.0  # 2-D path

    fwd = jax.jit(functools.partial(linear_mod, eps=1e-5))
    out = fwd(x, style, weight, bias)
    jax.block_until_ready(out)

    # plain-JAX reference (same math as the PyTorch module, all f32)
    s0 = style.reshape(-1, in_features)[0]
    w_mod = weight * s0[None, :]
    w_ref = w_mod / jnp.sqrt(jnp.sum(w_mod * w_mod, axis=-1, keepdims=True) + 1e-5)
    ref = x @ w_ref.T + bias

    assert out.shape == (batch, seq, out_features), out.shape
    assert bool(jnp.all(jnp.isfinite(out)))
    err = float(jnp.max(jnp.abs(out - ref)))
    assert err < 3e-2, f"max abs err {err}"   # tolerance for bf16 MXU feeds

    # no-bias path (exercises the has_bias=False kernel variant)
    out_nb = jax.jit(functools.partial(linear_mod, eps=1e-5))(x, style, weight, None)
    jax.block_until_ready(out_nb)
    ref_nb = x @ w_ref.T
    err_nb = float(jnp.max(jnp.abs(out_nb - ref_nb)))
    assert err_nb < 3e-2, f"max abs err (no bias) {err_nb}"

    print("KERNEL_OK")
</pallas_src>

<mosaic_0001>
module attributes {stable_mosaic.version = 11 : i64} {
  func.func @_linear_mod_kernel(%arg0: i32, %arg1: i32, %arg2: i32, %arg3: memref<1x128xf32, #tpu.memory_space<vmem>>, %arg4: memref<1x128xf32, #tpu.memory_space<vmem>>, %arg5: memref<1x128xf32, #tpu.memory_space<vmem>>, %arg6: memref<16x128xbf16, #tpu.memory_space<vmem>>, %arg7: memref<128x128xbf16, #tpu.memory_space<vmem>>, %arg8: memref<16x128xf32, #tpu.memory_space<vmem>>, %arg9: memref<16x128xf32, #tpu.memory_space<vmem>>) attributes {dimension_semantics = [#tpu.dimension_semantics<parallel>, #tpu.dimension_semantics<parallel>, #tpu.dimension_semantics<arbitrary>], iteration_bounds = array<i64: 1, 1, 1>, scalar_prefetch = 0 : i64, scratch_operands = 1 : i64, tpu.core_type = #tpu.core_type<tc>, window_params = [{transform_indices = @transform_0, window_bounds = array<i64: 1, 128>}, {transform_indices = @transform_1, window_bounds = array<i64: 1, 128>}, {transform_indices = @transform_2, window_bounds = array<i64: 1, 128>}, {transform_indices = @transform_3, window_bounds = array<i64: 16, 128>}, {transform_indices = @transform_4, window_bounds = array<i64: 128, 128>}, {transform_indices = @transform_5, window_bounds = array<i64: 16, 128>}]} {
    %c0_i32 = arith.constant 0 : i32
    %0 = arith.cmpi eq, %arg2, %c0_i32 : i32
    %1 = arith.extui %0 : i1 to i32
    %c0_i32_0 = arith.constant 0 : i32
    %2 = arith.cmpi ne, %1, %c0_i32_0 : i32
    scf.if %2 {
      %cst_12 = arith.constant 0.000000e+00 : f32
      %17 = vector.broadcast %cst_12 : f32 to vector<16x128xf32>
      %c0_13 = arith.constant 0 : index
      %c0_14 = arith.constant 0 : index
      %18 = vector.load %arg9[%c0_13, %c0_14] : memref<16x128xf32, #tpu.memory_space<vmem>>, vector<16x128xf32>
      tpu.vector_store %arg9[%c0_13, %c0_14], %17 {strides = array<i32>} : memref<16x128xf32, #tpu.memory_space<vmem>>, vector<16x128xf32>,
    } else {
    }
    %c0 = arith.constant 0 : index
    %c0_1 = arith.constant 0 : index
    %3 = vector.load %arg6[%c0, %c0_1] : memref<16x128xbf16, #tpu.memory_space<vmem>>, vector<16x128xbf16>
    %4 = arith.extf %3 : vector<16x128xbf16> to vector<16x128xf32>
    %c0_2 = arith.constant 0 : index
    %c0_3 = arith.constant 0 : index
    %5 = vector.load %arg3[%c0_2, %c0_3] : memref<1x128xf32, #tpu.memory_space<vmem>>, vector<1x128xf32>
    %6 = vector.broadcast %5 : vector<1x128xf32> to vector<16x128xf32>
    %7 = arith.mulf %4, %6 : vector<16x128xf32>
    %8 = arith.truncf %7 : vector<16x128xf32> to vector<16x128xbf16>
    %c0_4 = arith.constant 0 : index
    %c0_5 = arith.constant 0 : index
    %9 = vector.load %arg9[%c0_4, %c0_5] : memref<16x128xf32, #tpu.memory_space<vmem>>, vector<16x128xf32>
    %c0_6 = arith.constant 0 : index
    %c0_7 = arith.constant 0 : index
    %10 = vector.load %arg7[%c0_6, %c0_7] : memref<128x128xbf16, #tpu.memory_space<vmem>>, vector<128x128xbf16>
    %cst = arith.constant dense<0.000000e+00> : vector<16x128xf32>
    %11 = tpu.matmul %8, %10, %cst {dimension_numbers = #tpu.dot_dimension_numbers<[1], [0], [0], [1], [0, 0, 1, 1], [], []>} : vector<16x128xbf16>, vector<128x128xbf16>, vector<16x128xf32> -> vector<16x128xf32>
    %12 = arith.addf %9, %11 : vector<16x128xf32>
    %c0_8 = arith.constant 0 : index
    %c0_9 = arith.constant 0 : index
    %13 = vector.load %arg9[%c0_8, %c0_9] : memref<16x128xf32, #tpu.memory_space<vmem>>, vector<16x128xf32>
    tpu.vector_store %arg9[%c0_8, %c0_9], %12 {strides = array<i32>} : memref<16x128xf32, #tpu.memory_space<vmem>>, vector<16x128xf32>,
    %c0_i32_10 = arith.constant 0 : i32
    %14 = arith.cmpi eq, %arg2, %c0_i32_10 : i32
    %15 = arith.extui %14 : i1 to i32
    %c0_i32_11 = arith.constant 0 : i32
    %16 = arith.cmpi ne, %15, %c0_i32_11 : i32
    scf.if %16 {
      %c0_12 = arith.constant 0 : index
      %c0_13 = arith.constant 0 : index
      %17 = vector.load %arg9[%c0_12, %c0_13] : memref<16x128xf32, #tpu.memory_space<vmem>>, vector<16x128xf32>
      %c0_14 = arith.constant 0 : index
      %c0_15 = arith.constant 0 : index
      %18 = vector.load %arg4[%c0_14, %c0_15] : memref<1x128xf32, #tpu.memory_space<vmem>>, vector<1x128xf32>
      %19 = vector.broadcast %18 : vector<1x128xf32> to vector<16x128xf32>
      %20 = arith.mulf %17, %19 : vector<16x128xf32>
      %c0_16 = arith.constant 0 : index
      %c0_17 = arith.constant 0 : index
      %21 = vector.load %arg5[%c0_16, %c0_17] : memref<1x128xf32, #tpu.memory_space<vmem>>, vector<1x128xf32>
      %22 = vector.broadcast %21 : vector<1x128xf32> to vector<16x128xf32>
      %23 = arith.addf %20, %22 : vector<16x128xf32>
      %c0_18 = arith.constant 0 : index
      %c0_19 = arith.constant 0 : index
      %24 = vector.load %arg8[%c0_18, %c0_19] : memref<16x128xf32, #tpu.memory_space<vmem>>, vector<16x128xf32>
      tpu.vector_store %arg8[%c0_18, %c0_19], %23 {strides = array<i32>} : memref<16x128xf32, #tpu.memory_space<vmem>>, vector<16x128xf32>,
    } else {
    }
    return
  }
  func.func @transform_0(%arg0: i32, %arg1: i32, %arg2: i32) -> (i32, i32) {
    %c0_i32 = arith.constant 0 : i32
    %c0_i32_0 = arith.constant 0 : i32
    return %c0_i32, %arg2 : i32, i32
  }
  func.func @transform_1(%arg0: i32, %arg1: i32, %arg2: i32) -> (i32, i32) {
    %c0_i32 = arith.constant 0 : i32
    %c0_i32_0 = arith.constant 0 : i32
    return %c0_i32, %arg1 : i32, i32
  }
  func.func @transform_2(%arg0: i32, %arg1: i32, %arg2: i32) -> (i32, i32) {
    %c0_i32 = arith.constant 0 : i32
    %c0_i32_0 = arith.constant 0 : i32
    return %c0_i32, %arg1 : i32, i32
  }
  func.func @transform_3(%arg0: i32, %arg1: i32, %arg2: i32) -> (i32, i32) {
    %c0_i32 = arith.constant 0 : i32
    return %arg0, %arg2 : i32, i32
  }
  func.func @transform_4(%arg0: i32, %arg1: i32, %arg2: i32) -> (i32, i32) {
    %c0_i32 = arith.constant 0 : i32
    return %arg2, %arg1 : i32, i32
  }
  func.func @transform_5(%arg0: i32, %arg1: i32, %arg2: i32) -> (i32, i32) {
    %c0_i32 = arith.constant 0 : i32
    return %arg0, %arg1 : i32, i32
  }
}

</mosaic_0001>

<bundles_post_ra>
// kernel: linear_mod.1
= control target key start
LH: loop header
LB: loop body
LE: loop exit
PB: predicated region body
PF: predicated region fallthrough
CT: control target
= control target key end

     0   :  { %v235_v0 = vmov 0.0   ;;  %vm236_vm0 = vmmov 0   ;;  %s309_s4 = inlined_call_operand.vmem [shape: bf16[128,128], index: 4, kind: input, shape index: {}]   ;;  %s310_s3 = inlined_call_operand.vmem [shape: bf16[16,128], index: 3, kind: input, shape index: {}]   ;;  %s311_s0 = inlined_call_operand.vmem [shape: f32[1,128], index: 0, kind: input, shape index: {}]   ;;  %s312_s1 = inlined_call_operand.vmem [shape: f32[1,128], index: 1, kind: input, shape index: {}]   ;;  %s313_s2 = inlined_call_operand.vmem [shape: f32[1,128], index: 2, kind: input, shape index: {}]   ;;  %s314_s5 = inlined_call_operand.vmem [shape: f32[16,128], index: 5, kind: output, shape index: {}]  }
   0x1   :  { %205 = vmatprep.subr.bf16.mxu0 %v235_v0  ;;  %v227_v1 = vld [vmem:[%s309_s4] sm:$0xff]   ;;  %221 = vmatprep.mubr.msk.bf16.mxu0 %vm236_vm0, %v235_v0  ;;  %v228_v2 = vld [vmem:[%s309_s4 + $0x8] sm:$0xff]   ;;  %v229_v3 = vld [vmem:[%s309_s4 + $0x10] sm:$0xff]  }
   0x2   :  { %206 = vmatpush3.bf16.msra.mxu0 %v227_v1  ;;  %v230_v4 = vld [vmem:[%s309_s4 + $0x18] sm:$0xff]   ;;  %v231_v5 = vld [vmem:[%s309_s4 + $0x20] sm:$0xff]   ;;  %v232_v6 = vld [vmem:[%s309_s4 + $0x28] sm:$0xff]  }
   0x3   :  { %207 = vmatprep.subr.bf16.mxu0 %v235_v0  ;;  %v193_v7 = vld [vmem:[%s310_s3] sm:$0xff]   ;;  %v233_v10 = vld [vmem:[%s309_s4 + $0x30] sm:$0xff]   ;;  %v234_v14 = vld [vmem:[%s309_s4 + $0x38] sm:$0xff]  }
   0x4   :  { %v194_v8 = vunpack.c.l.bf16 %v193_v7  ;;  %v195_v9 = vunpack.c.h.bf16 %v193_v7  ;;  %v181_v11 = vld [vmem:[%s311_s0] ss:$0 sm:$0xff] }
   0x5   :  { %v190_v16 = vld [vmem:[%s312_s1] ss:$0 sm:$0xff] }
   0x6   :  { %208 = vmatpush3.bf16.msra.mxu0 %v228_v2  ;;  %v38_v12 = vmul.f32 %v194_v8, %v181_v11  ;;  %v39_v13 = vmul.f32 %v195_v9, %v181_v11  ;;  %v191_v18 = vld [vmem:[%s313_s2] ss:$0 sm:$0xff] }
   0x7   :  { %209 = vmatprep.subr.bf16.mxu0 %v235_v0 }
   0x8   :  { %v40_v15 = vpack.c.bf16 %v39_v13, %v38_v12 }
   0xa   :  { %210 = vmatpush3.bf16.msra.mxu0 %v229_v3 }
   0xb   :  { %211 = vmatprep.subr.bf16.mxu0 %v235_v0 }
   0xe   :  { %212 = vmatpush3.bf16.msra.mxu0 %v230_v4 }
   0xf   :  { %213 = vmatprep.subr.bf16.mxu0 %v235_v0 }
  0x12   :  { %214 = vmatpush3.bf16.msra.mxu0 %v231_v5 }
  0x13   :  { %215 = vmatprep.subr.bf16.mxu0 %v235_v0 }
  0x16   :  { %216 = vmatpush3.bf16.msra.mxu0 %v232_v6 }
  0x17   :  { %217 = vmatprep.subr.bf16.mxu0 %v235_v0 }
  0x1a   :  { %218 = vmatpush3.bf16.msra.mxu0 %v233_v10 }
  0x1b   :  { %219 = vmatprep.subr.bf16.mxu0 %v235_v0 }
  0x1e   :  { %220 = vmatpush3.bf16.msra.mxu0 %v234_v14 }
  0x21   :  { %222 = vmatmul.mubr.bf16.vlgmr.msra.gmra.mrb[0].mxu0 %v40_v15 }
  0xf4   :  { %v141_v17 = vpop.f32.mrb[0].mxu0 }
  0xf5   :  { %v164_v19 = vmul.f32 %v190_v16, %v141_v17  ;;  %v223_v20 = vpop.f32.mrb[1].mxu0 }
  0xf6   :  { %v144_v21 = vpop.f32.mrb[2].mxu0 }
  0xf7   :  { %v173_v22 = vadd.f32 %v191_v18, %v164_v19  ;;  %v165_v23 = vmul.f32 %v190_v16, %v144_v21  ;;  %v224_v24 = vpop.f32.mrb[3].mxu0 }
  0xf9   :  { %175 = vst [vmem:[%s314_s5] sm:$0xff] %v173_v22  ;;  %v174_v25 = vadd.f32 %v191_v18, %v165_v23 }
  0xfb   :  { %176 = vst [vmem:[%s314_s5 + $0x8] sm:$0xff] %v174_v25 }

</bundles_post_ra>
